<compile_context>
chip_gen: v6e
topology: v6e:2x2x1
jax: 0.10.0
libtpu: 0.0.40
codegen_flags: <defaults>
</compile_context>

<pallas_src>
import functools
import math

import jax
import jax.numpy as jnp
from jax.experimental import pallas as pl
from jax.experimental.pallas import tpu as pltpu


def _pick_tile(dim, targets):
    """Largest target tile that evenly divides `dim`; fall back to full dim."""
    for t in targets:
        if dim >= t and dim % t == 0:
            return t
    # TODO(synk): for large dims not divisible by 128, switch to a pl.cdiv grid
    # with padded/masked edge blocks instead of one giant full-dim block.
    return dim


# ----------------------------------------------------------------------------
# Kernel 1: tiled dense linear layer  y = x @ W + b   (W pre-transposed, bf16)
# grid = (M//tm, N//tn, K//tk); f32 accumulator in VMEM scratch.
# ----------------------------------------------------------------------------
def _linear_kernel(x_ref, w_ref, b_ref, o_ref, acc_ref):
    @pl.when(pl.program_id(2) == 0)
    def _init():
        acc_ref[...] = jnp.zeros_like(acc_ref)

    # Feed the MXU its native bf16 (v5e/v6e/v7x), accumulate in f32.
    x = x_ref[...].astype(jnp.bfloat16)
    w = w_ref[...].astype(jnp.bfloat16)
    acc_ref[...] += jnp.dot(x, w, preferred_element_type=jnp.float32)

    @pl.when(pl.program_id(2) == pl.num_programs(2) - 1)
    def _finalize():
        o_ref[...] = (acc_ref[...] + b_ref[...]).astype(o_ref.dtype)


def linear(x2d, w_t, b, out_dtype=None):
    """x2d: (M, K); w_t: (K, N) pre-transposed bf16 weight; b: (N,) f32."""
    M, K = x2d.shape
    N = w_t.shape[1]
    out_dtype = out_dtype or x2d.dtype
    tm = _pick_tile(M, (512, 256, 128))
    tn = _pick_tile(N, (512, 256, 128))
    # Prefer a single K step (full-K tile): the x tile is then read once per
    # (i, j) instead of being re-streamed across the K axis; bf16 operands keep
    # the footprint well under the 48 MiB scoped budget (v7x: 64 MiB physical).
    if K % 128 == 0 and K <= 2048:
        tk = K
    else:
        tk = _pick_tile(K, (2048, 1024, 512, 256, 128))
    grid = (M // tm, N // tn, K // tk)
    return pl.pallas_call(
        _linear_kernel,
        out_shape=jax.ShapeDtypeStruct((M, N), out_dtype),
        grid=grid,
        in_specs=[
            pl.BlockSpec((tm, tk), lambda i, j, k: (i, k)),
            pl.BlockSpec((tk, tn), lambda i, j, k: (k, j)),
            pl.BlockSpec((1, tn), lambda i, j, k: (0, j)),
        ],
        out_specs=pl.BlockSpec((tm, tn), lambda i, j, k: (i, j)),
        scratch_shapes=[pltpu.VMEM((tm, tn), jnp.float32)],
        compiler_params=pltpu.CompilerParams(
            dimension_semantics=("parallel", "parallel", "arbitrary"),
            vmem_limit_bytes=48 * 1024 * 1024),
    )(x2d, w_t, b.reshape(1, N))


# ----------------------------------------------------------------------------
# Kernel 2: flash-style multi-head attention
# grid = (B, head_groups, Sq//tq, Sk//tk); online softmax with running max /
# denominator / accumulator in VMEM scratch; output written lane-dense as
# (B, Sq, E) (per-head slab stores at finalize, no HBM transpose afterwards).
# ----------------------------------------------------------------------------
def _flash_attn_kernel(*refs, heads_per_group, head_dim, has_mask):
    if has_mask:
        q_ref, k_ref, v_ref, mask_ref, o_ref, m_sc, l_sc, acc_sc = refs
    else:
        q_ref, k_ref, v_ref, o_ref, m_sc, l_sc, acc_sc = refs
        mask_ref = None

    ki = pl.program_id(3)

    @pl.when(ki == 0)
    def _init():
        m_sc[...] = jnp.full_like(m_sc, -jnp.inf)
        l_sc[...] = jnp.zeros_like(l_sc)
        acc_sc[...] = jnp.zeros_like(acc_sc)

    # 1/sqrt(head_dim) is folded into the query projection weights at init.
    q = q_ref[0]                  # (Hg, tq, D) bf16
    k = k_ref[0]                  # (Hg, tk, D) bf16
    v = v_ref[0]                  # (Hg, tk, D) bf16

    # Batched QK^T over heads; contraction on the last dim of both operands,
    # so K is consumed in its natural (tk, D) layout. bf16 in, f32 out.
    s = jnp.einsum("hqd,hkd->hqk", q, k, preferred_element_type=jnp.float32)
    if has_mask:
        s = s + mask_ref[...].astype(jnp.float32)[None, :, :]

    m_prev = m_sc[...]                                        # (Hg, tq, 1)
    m_new = jnp.maximum(m_prev, jnp.max(s, axis=-1, keepdims=True))
    alpha = jnp.exp(m_prev - m_new)
    p = jnp.exp(s - m_new)                                    # (Hg, tq, tk) f32
    l_sc[...] = alpha * l_sc[...] + jnp.sum(p, axis=-1, keepdims=True)
    acc_sc[...] = alpha * acc_sc[...] + jnp.einsum(
        "hqk,hkd->hqd", p.astype(jnp.bfloat16), v,
        preferred_element_type=jnp.float32)
    m_sc[...] = m_new

    @pl.when(ki == pl.num_programs(3) - 1)
    def _finalize():
        # NOTE: fully -inf-masked rows produce NaN, same as the reference.
        inv_l = pl.reciprocal(l_sc[...], approx=True)         # EUP path
        ctx = acc_sc[...] * inv_l                             # (Hg, tq, D) f32
        # Lane-dense output: scatter each head's (tq, D) slab into the
        # (tq, Hg*D) block with static slices -- no transpose/reshape, and the
        # HBM writeback is a dense E-wide store.
        for h in range(heads_per_group):
            o_ref[0, :, h * head_dim:(h + 1) * head_dim] = ctx[h].astype(o_ref.dtype)


def _attn_footprint_bytes(hg, tq, tk, d):
    inputs = 2 * (hg * tq * d + 2 * hg * tk * d) * 2       # double-buffered bf16 q/k/v
    mask = 2 * tq * tk * 2                                  # bf16 mask block
    scratch = hg * tq * (d + 2) * 4                         # m/l/acc f32
    temps = 2 * hg * tq * tk * 4                            # s and p f32
    out = 2 * tq * hg * d * 2                               # bf16 output block
    return inputs + mask + scratch + temps + out


def _pick_head_group(num_heads, head_dim, tq, tk, budget=16 * 1024 * 1024):
    """Largest head group with a lane-dense output slab that fits the budget."""
    smallest_valid = num_heads
    for hg in range(num_heads, 0, -1):
        if num_heads % hg:
            continue
        if hg != num_heads and (hg * head_dim) % 128 != 0:
            continue  # output block (tq, hg*D) must be 128-lane aligned
        smallest_valid = hg
        if _attn_footprint_bytes(hg, tq, tk, head_dim) <= budget:
            return hg
    return smallest_valid


def flash_attention(qh, kh, vh, mask=None):
    """qh: (B, H, Sq, D); kh/vh: (B, H, Sk, D) (bf16). mask: optional (Sq, Sk).

    Softmax scale is pre-folded into the query projection. Returns the
    attention context in lane-dense (B, Sq, H*D) bf16 layout."""
    B, H, Sq, D = qh.shape
    Sk = kh.shape[2]
    E = H * D
    tq = _pick_tile(Sq, (512, 256, 128))
    # Keep the KV tile modest: exp/VPU work scales linearly with tk while MXU
    # efficiency saturates by 256; spend VMEM on tq / heads instead.
    tk = _pick_tile(Sk, (256, 128))
    hg = _pick_head_group(H, D, tq, tk)
    grid = (B, H // hg, Sq // tq, Sk // tk)

    in_specs = [
        pl.BlockSpec((1, hg, tq, D), lambda b, g, qi, ki: (b, g, qi, 0)),
        pl.BlockSpec((1, hg, tk, D), lambda b, g, qi, ki: (b, g, ki, 0)),
        pl.BlockSpec((1, hg, tk, D), lambda b, g, qi, ki: (b, g, ki, 0)),
    ]
    inputs = [qh, kh, vh]
    if mask is not None:
        in_specs.append(pl.BlockSpec((tq, tk), lambda b, g, qi, ki: (qi, ki)))
        inputs.append(mask.astype(jnp.bfloat16))

    kernel = functools.partial(_flash_attn_kernel, heads_per_group=hg,
                               head_dim=D, has_mask=mask is not None)
    return pl.pallas_call(
        kernel,
        out_shape=jax.ShapeDtypeStruct((B, Sq, E), jnp.bfloat16),
        grid=grid,
        in_specs=in_specs,
        out_specs=pl.BlockSpec((1, tq, hg * D), lambda b, g, qi, ki: (b, qi, g)),
        scratch_shapes=[
            pltpu.VMEM((hg, tq, 1), jnp.float32),   # running max
            pltpu.VMEM((hg, tq, 1), jnp.float32),   # running denominator
            pltpu.VMEM((hg, tq, D), jnp.float32),   # output accumulator
        ],
        compiler_params=pltpu.CompilerParams(
            dimension_semantics=("parallel", "parallel", "parallel", "arbitrary"),
            vmem_limit_bytes=48 * 1024 * 1024),
    )(*inputs)


# ----------------------------------------------------------------------------
# Module wrapper
# ----------------------------------------------------------------------------
def init_mha_params(key, embed_dim, num_heads):
    head_dim = embed_dim // num_heads
    ks = jax.random.split(key, 8)
    bound = 1.0 / math.sqrt(embed_dim)

    def lin(kw, kb):
        # Stored pre-transposed (E_in, E_out): consumed directly by the GEMM.
        w_t = jax.random.uniform(kw, (embed_dim, embed_dim), jnp.float32,
                                 -bound, bound)
        b = jax.random.uniform(kb, (embed_dim,), jnp.float32, -bound, bound)
        return w_t, b

    ref = {
        "query": lin(ks[0], ks[1]),
        "key": lin(ks[2], ks[3]),
        "value": lin(ks[4], ks[5]),
        "out_proj": lin(ks[6], ks[7]),
    }

    scale = 1.0 / math.sqrt(head_dim)
    wq, bq = ref["query"]
    wk, bk = ref["key"]
    wv, bv = ref["value"]
    wo, bo = ref["out_proj"]

    # Kernel-side weights: bf16 (MXU-native, halves the weight HBM read) with
    # the softmax scale folded into W_q / b_q. Biases stay f32 (added to the
    # f32 accumulator at GEMM finalize).
    kern = {
        "query": ((wq * scale).astype(jnp.bfloat16), bq * scale),
        "key": (wk.astype(jnp.bfloat16), bk),
        "value": (wv.astype(jnp.bfloat16), bv),
        "out_proj": (wo.astype(jnp.bfloat16), bo),
        # Pre-concatenated fused QKV weights (self-attention fast path).
        "qkv_fused": (
            jnp.concatenate([wq * scale, wk, wv], axis=1).astype(jnp.bfloat16),
            jnp.concatenate([bq * scale, bk, bv], axis=0),
        ),
    }
    return {"ref": ref, "kernel": kern}


def multi_head_attention(params, num_heads, query, key, value, attn_mask=None):
    B, Sq, E = query.shape
    Sk = key.shape[1]
    D = E // num_heads
    assert D * num_heads == E
    kern = params["kernel"]

    if (query is key) and (key is value):
        # Self-attention: single fused projection reads the activation once.
        # TODO(synk): identity check won't trigger for equal-but-distinct arrays.
        qkv = linear(query.reshape(B * Sq, E), *kern["qkv_fused"],
                     out_dtype=jnp.bfloat16)
        qkv = qkv.reshape(B, Sq, 3, num_heads, D)
        q, k, v = qkv[:, :, 0], qkv[:, :, 1], qkv[:, :, 2]
    else:
        q = linear(query.reshape(B * Sq, E), *kern["query"],
                   out_dtype=jnp.bfloat16).reshape(B, Sq, num_heads, D)
        k = linear(key.reshape(B * Sk, E), *kern["key"],
                   out_dtype=jnp.bfloat16).reshape(B, Sk, num_heads, D)
        v = linear(value.reshape(B * Sk, E), *kern["value"],
                   out_dtype=jnp.bfloat16).reshape(B, Sk, num_heads, D)

    # Head-major relayout for the attention kernel (now a half-size bf16 pass).
    # TODO(synk): fold this transpose into the flash kernel's in_specs
    # (head-strided VMEM loads) to drop the remaining HBM round trip.
    qh = q.transpose(0, 2, 1, 3)
    kh = k.transpose(0, 2, 1, 3)
    vh = v.transpose(0, 2, 1, 3)

    # TODO(synk): only a single 2-D (Sq, Sk) additive mask is supported (no
    # per-batch/per-head masks or key_padding_mask).
    ctx = flash_attention(qh, kh, vh, attn_mask)        # (B, Sq, E), lane dense

    out = linear(ctx.reshape(B * Sq, E), *kern["out_proj"], out_dtype=query.dtype)
    return out.reshape(B, Sq, E)


# Pure-JAX f32 reference for sanity checking (weights pre-transposed).
def reference_mha(params, num_heads, query, key, value, attn_mask=None):
    ref = params["ref"]
    B, Sq, E = query.shape
    D = E // num_heads

    def lin(x, p):
        return x @ p[0] + p[1]

    q = lin(query, ref["query"]).reshape(B, Sq, num_heads, D).transpose(0, 2, 1, 3)
    k = lin(key, ref["key"]).reshape(B, -1, num_heads, D).transpose(0, 2, 1, 3)
    v = lin(value, ref["value"]).reshape(B, -1, num_heads, D).transpose(0, 2, 1, 3)
    scores = jnp.einsum("bhqd,bhkd->bhqk", q, k) / math.sqrt(D)
    if attn_mask is not None:
        scores = scores + attn_mask
    attn = jax.nn.softmax(scores, axis=-1)
    ctx = jnp.einsum("bhqk,bhkd->bhqd", attn, v)
    ctx = ctx.transpose(0, 2, 1, 3).reshape(B, Sq, E)
    return lin(ctx, ref["out_proj"])


if __name__ == "__main__":
    B, S, E, H = 2, 8, 32, 4  # batch, seq, embed_dim, num_heads

    root = jax.random.PRNGKey(0)
    kp, kq, kk, kv = jax.random.split(root, 4)
    params = init_mha_params(kp, E, H)

    query = jax.random.normal(kq, (B, S, E), jnp.float32)
    key_in = jax.random.normal(kk, (B, S, E), jnp.float32)
    value = jax.random.normal(kv, (B, S, E), jnp.float32)

    # Tolerances account for the bf16 MXU feed (f32 accumulation) vs f32 ref.
    TOL = 5e-2

    # 1) self-attention (fused QKV fast path), no mask -- mask DMA/add skipped.
    out_self = multi_head_attention(params, H, query, query, query)
    out_self = jax.block_until_ready(out_self)
    ref_self = reference_mha(params, H, query, query, query)
    assert out_self.shape == (B, S, E)
    assert jnp.allclose(out_self, ref_self, atol=TOL, rtol=TOL), \
        "self-attention mismatch vs reference"

    # 2) cross-tensor attention with a causal additive mask.
    causal = jnp.where(jnp.tril(jnp.ones((S, S), dtype=bool)),
                       0.0, -1e9).astype(jnp.float32)
    out_x = multi_head_attention(params, H, query, key_in, value,
                                 attn_mask=causal)
    out_x = jax.block_until_ready(out_x)
    ref_x = reference_mha(params, H, query, key_in, value, attn_mask=causal)
    assert jnp.allclose(out_x, ref_x, atol=TOL, rtol=TOL), \
        "masked attention mismatch vs reference"

    print("KERNEL_OK")
</pallas_src>

<mosaic_0001>
module attributes {stable_mosaic.version = 11 : i64} {
  func.func @_linear_kernel(%arg0: i32, %arg1: i32, %arg2: i32, %arg3: memref<16x32xf32, #tpu.memory_space<vmem>>, %arg4: memref<32x96xbf16, #tpu.memory_space<vmem>>, %arg5: memref<1x96xf32, #tpu.memory_space<vmem>>, %arg6: memref<16x96xbf16, #tpu.memory_space<vmem>>, %arg7: memref<16x96xf32, #tpu.memory_space<vmem>>) attributes {dimension_semantics = [#tpu.dimension_semantics<parallel>, #tpu.dimension_semantics<parallel>, #tpu.dimension_semantics<arbitrary>], iteration_bounds = array<i64: 1, 1, 1>, scalar_prefetch = 0 : i64, scratch_operands = 1 : i64, tpu.core_type = #tpu.core_type<tc>, window_params = [{transform_indices = @transform_0, window_bounds = array<i64: 16, 32>}, {transform_indices = @transform_1, window_bounds = array<i64: 32, 96>}, {transform_indices = @transform_2, window_bounds = array<i64: 1, 96>}, {transform_indices = @transform_3, window_bounds = array<i64: 16, 96>}]} {
    %c0_i32 = arith.constant 0 : i32
    %0 = arith.cmpi eq, %arg2, %c0_i32 : i32
    %1 = arith.extui %0 : i1 to i32
    %c0_i32_0 = arith.constant 0 : i32
    %2 = arith.cmpi ne, %1, %c0_i32_0 : i32
    scf.if %2 {
      %cst_10 = arith.constant 0.000000e+00 : f32
      %13 = vector.broadcast %cst_10 : f32 to vector<16x96xf32>
      %c0_11 = arith.constant 0 : index
      %c0_12 = arith.constant 0 : index
      %14 = vector.load %arg7[%c0_11, %c0_12] : memref<16x96xf32, #tpu.memory_space<vmem>>, vector<16x96xf32>
      tpu.vector_store %arg7[%c0_11, %c0_12], %13 {strides = array<i32>} : memref<16x96xf32, #tpu.memory_space<vmem>>, vector<16x96xf32>,
    } else {
    }
    %c0 = arith.constant 0 : index
    %c0_1 = arith.constant 0 : index
    %3 = vector.load %arg3[%c0, %c0_1] : memref<16x32xf32, #tpu.memory_space<vmem>>, vector<16x32xf32>
    %4 = arith.truncf %3 : vector<16x32xf32> to vector<16x32xbf16>
    %c0_2 = arith.constant 0 : index
    %c0_3 = arith.constant 0 : index
    %5 = vector.load %arg4[%c0_2, %c0_3] : memref<32x96xbf16, #tpu.memory_space<vmem>>, vector<32x96xbf16>
    %c0_4 = arith.constant 0 : index
    %c0_5 = arith.constant 0 : index
    %6 = vector.load %arg7[%c0_4, %c0_5] : memref<16x96xf32, #tpu.memory_space<vmem>>, vector<16x96xf32>
    %cst = arith.constant dense<0.000000e+00> : vector<16x96xf32>
    %7 = tpu.matmul %4, %5, %cst {dimension_numbers = #tpu.dot_dimension_numbers<[1], [0], [0], [1], [0, 0, 1, 1], [], []>} : vector<16x32xbf16>, vector<32x96xbf16>, vector<16x96xf32> -> vector<16x96xf32>
    %8 = arith.addf %6, %7 : vector<16x96xf32>
    %c0_6 = arith.constant 0 : index
    %c0_7 = arith.constant 0 : index
    %9 = vector.load %arg7[%c0_6, %c0_7] : memref<16x96xf32, #tpu.memory_space<vmem>>, vector<16x96xf32>
    tpu.vector_store %arg7[%c0_6, %c0_7], %8 {strides = array<i32>} : memref<16x96xf32, #tpu.memory_space<vmem>>, vector<16x96xf32>,
    %c0_i32_8 = arith.constant 0 : i32
    %10 = arith.cmpi eq, %arg2, %c0_i32_8 : i32
    %11 = arith.extui %10 : i1 to i32
    %c0_i32_9 = arith.constant 0 : i32
    %12 = arith.cmpi ne, %11, %c0_i32_9 : i32
    scf.if %12 {
      %c0_10 = arith.constant 0 : index
      %c0_11 = arith.constant 0 : index
      %13 = vector.load %arg7[%c0_10, %c0_11] : memref<16x96xf32, #tpu.memory_space<vmem>>, vector<16x96xf32>
      %c0_12 = arith.constant 0 : index
      %c0_13 = arith.constant 0 : index
      %14 = vector.load %arg5[%c0_12, %c0_13] : memref<1x96xf32, #tpu.memory_space<vmem>>, vector<1x96xf32>
      %15 = vector.broadcast %14 : vector<1x96xf32> to vector<16x96xf32>
      %16 = arith.addf %13, %15 : vector<16x96xf32>
      %17 = arith.truncf %16 : vector<16x96xf32> to vector<16x96xbf16>
      %c0_14 = arith.constant 0 : index
      %c0_15 = arith.constant 0 : index
      %18 = vector.load %arg6[%c0_14, %c0_15] : memref<16x96xbf16, #tpu.memory_space<vmem>>, vector<16x96xbf16>
      tpu.vector_store %arg6[%c0_14, %c0_15], %17 {strides = array<i32>} : memref<16x96xbf16, #tpu.memory_space<vmem>>, vector<16x96xbf16>,
    } else {
    }
    return
  }
  func.func @transform_0(%arg0: i32, %arg1: i32, %arg2: i32) -> (i32, i32) {
    %c0_i32 = arith.constant 0 : i32
    return %arg0, %arg2 : i32, i32
  }
  func.func @transform_1(%arg0: i32, %arg1: i32, %arg2: i32) -> (i32, i32) {
    %c0_i32 = arith.constant 0 : i32
    return %arg2, %arg1 : i32, i32
  }
  func.func @transform_2(%arg0: i32, %arg1: i32, %arg2: i32) -> (i32, i32) {
    %c0_i32 = arith.constant 0 : i32
    %c0_i32_0 = arith.constant 0 : i32
    return %c0_i32, %arg1 : i32, i32
  }
  func.func @transform_3(%arg0: i32, %arg1: i32, %arg2: i32) -> (i32, i32) {
    %c0_i32 = arith.constant 0 : i32
    return %arg0, %arg1 : i32, i32
  }
}

</mosaic_0001>

<bundles_post_ra>
// kernel: tpu_custom_call.1
= control target key start
LH: loop header
LB: loop body
LE: loop exit
PB: predicated region body
PF: predicated region fallthrough
CT: control target
= control target key end

     0   :  { %8 = vsyncpa [#allocation4], 0  ;;  %s312_s0 = inlined_call_operand.hbm [shape: f32[16,32], index: 0, kind: input, shape index: {}]   ;;  %s313_s1 = inlined_call_operand.hbm [shape: bf16[32,96], index: 1, kind: input, shape index: {}]   ;;  %s314_s2 = inlined_call_operand.vmem [shape: f32[1,96], index: 2, kind: input, shape index: {}]   ;;  %s315_s3 = inlined_call_operand.hbm [shape: bf16[16,96], index: 3, kind: output, shape index: {}]  }
   0x1   :  { %9 = vsyncpa [#allocation7], 0 }
   0x2   :  { %10 = vsyncpa [#allocation5], 0  ;;  %s261_s12 = smov [#allocation3]  }
   0x3   :  { %s16_s13 = sshll.u32 %s261_s12, 4  ;;  %s17_s13 = int_to_ptr.vmem [resolvable:$true] %s16_s13 }
   0x4   :  { %s203_s14 = scalar_lea.vmem %s17_s13, 256  ;;  %p208_p1 = scmp.lt.s32.totalorder %s17_s13, %s17_s13 }
   0x5   :  { %p204_p0 = scmp.ne.s32.totalorder %s17_s13, %s203_s14  ;;  %p209_p2 = scmp.lt.s32.totalorder %s203_s14, %s203_s14 }
   0x7   :  { %p210_p3 = por %p209_p2, %p208_p1 }
   0x9   :  { %p211_p4 = pnand %p210_p3, %p204_p0 }
   0xb   :  { %214 = shalt.err (!%p211_p4)
}
   0xc   :  { %s262_s15 = smov 128   ;;  %s263_s16 = smov 8  }
   0xd   :  { %22 = dma.hbm_to_vmem [thread:$0]  %s312_s0, 256, %s17_s13, [#allocation4], %s262_s15, %s262_s15, %s263_s16  }
   0xe   :  { %s264_s19 = smov [#allocation6]  }
   0xf   :  { %s28_s20 = sshll.u32 %s264_s19, 4  ;;  %s29_s20 = int_to_ptr.vmem [resolvable:$true] %s28_s20 }
  0x10   :  { %s223_s21 = scalar_lea.vmem %s29_s20, 256  ;;  %p228_p6 = scmp.lt.s32.totalorder %s29_s20, %s29_s20 }
  0x11   :  { %p224_p5 = scmp.ne.s32.totalorder %s29_s20, %s223_s21  ;;  %p229_p7 = scmp.lt.s32.totalorder %s223_s21, %s223_s21 }
  0x13   :  { %p230_p8 = por %p229_p7, %p228_p6 }
  0x15   :  { %p231_p9 = pnand %p230_p8, %p224_p5 }
  0x17   :  { %234 = shalt.err (!%p231_p9)
}
  0x18   :  { %s265_s22 = smov 64   ;;  %s266_s23 = smov 4  }
  0x19   :  { %34 = dma.hbm_to_vmem [thread:$0]  %s313_s1, 256, %s29_s20, [#allocation7], %s265_s22, %s265_s22, %s266_s23  }
  0x1a   :  { %255 = dma.done.wait [#allocation4], 256  }
  0x1b   :  { %256 = vsyncadd [#allocation4], 4294967040 }
  0x1c   :  { %257 = dma.done.wait [#allocation7], 256  }
  0x1d   :  { %258 = vsyncadd [#allocation7], 4294967040  ;;  %vm48_vm0 = vcmask 785408   ;;  %v267_v0 = vmov 0.0   ;;  %vm268_vm1 = vmmov 0   ;;  %v193_v1 = vld [vmem:[#allocation6 + $0x8] sm:$0xff]  }
  0x1e   :  { %49 = vst.msk [vmem:[#allocation2] sm:$0xff] %vm48_vm0, %v267_v0  ;;  %50 = vst.msk [vmem:[#allocation2 + $0x8] sm:$0xff] %vm48_vm0, %v267_v0  ;;  %176 = vmatprep.subr.bf16.mxu0 %v267_v0  ;;  %180 = vmatprep.mubr.msk.bf16.mxu0 %vm268_vm1, %v267_v0  ;;  %v194_v2 = vld [vmem:[#allocation6] sm:$0xff]   ;;  %v51_v3 = vld [vmem:[#allocation3] sm:$0xff]  ;;  %vm72_vm2 = vcmask 261120   ;;  %vm144_vm3 = vcmask 781312  }
  0x1f   :  { %177 = vmatpush3.bf16.msra.mxu0 %v193_v1  ;;  %v52_v4 = vld [vmem:[#allocation3 + $0x8] sm:$0xff]  ;;  %v168_v14 = vld [vmem:[%s314_s2] ss:$0 sm:$0xff]  ;;  %s269_s26 = smov [#allocation8]  }
  0x20   :  { %178 = vmatprep.subr.bf16.mxu0 %v267_v0  ;;  %v53_v5 = vpack.c.bf16 %v52_v4, %v51_v3  ;;  %s152_s27 = sshll.u32 %s269_s26, 4  ;;  %s153_s27 = int_to_ptr.vmem [resolvable:$true] %s152_s27 }
  0x21   :  { %s235_s28 = scalar_lea.vmem %s153_s27, 128  ;;  %p240_p11 = scmp.lt.s32.totalorder %s153_s27, %s153_s27 }
  0x22   :  { %p236_p10 = scmp.ne.s32.totalorder %s153_s27, %s235_s28  ;;  %p241_p12 = scmp.lt.s32.totalorder %s235_s28, %s235_s28 }
  0x23   :  { %179 = vmatpush3.bf16.msra.mxu0 %v194_v2 }
  0x24   :  { %p242_p13 = por %p241_p12, %p240_p11 }
  0x25   :  { %v58_v6 = vld [vmem:[#allocation2] sm:$0xff]  ;;  %v59_v10 = vld [vmem:[#allocation2 + $0x8] sm:$0xff] }
  0x26   :  { %181 = vmatmul.mubr.msk.bf16.vlgmr.msra.gmra.mxu0 %vm72_vm2, %v53_v5  ;;  %p243_p0 = pnand %p242_p13, %p236_p10 }
  0xe6   :  { %v110_v7 = vpop.f32.mrf.mxu0 }
  0xe7   :  { %v117_v8 = vadd.f32 %v110_v7, %v58_v6 }
  0xe8   :  { %v182_v9 = vpop.f32.mrf.mxu0 }
  0xe9   :  { %120 = vst.msk [vmem:[#allocation2] sm:$0xff] %vm48_vm0, %v117_v8 }
  0xea   :  { %v113_v11 = vpop.f32.mrf.mxu0 }
  0xeb   :  { %v118_v12 = vadd.f32 %v113_v11, %v59_v10 }
  0xec   :  { %v183_v13 = vpop.f32.mrf.mxu0 }
  0xed   :  { %121 = vst.msk [vmem:[#allocation2 + $0x8] sm:$0xff] %vm48_vm0, %v118_v12 }
  0xf0   :  { %v125_v15 = vld [vmem:[#allocation2] sm:$0xff] }
  0xf1   :  { %v134_v16 = vadd.f32 %v168_v14, %v125_v15 }
  0xf3   :  { %v171_v17 = vpack.c.bf16 %v134_v16, %v134_v16 }
  0xf4   :  { %v126_v18 = vld [vmem:[#allocation2 + $0x8] sm:$0xff] }
  0xf5   :  { %v135_v19 = vadd.f32 %v168_v14, %v126_v18  ;;  %145 = vst.msk [vmem:[#allocation8] sm:$0xf] %vm144_vm3, %v171_v17 }
  0xf7   :  { %v172_v20 = vpack.c.bf16 %v135_v19, %v135_v19 }
  0xf9   :  { %146 = vst.msk [vmem:[#allocation8 + $0x4] sm:$0xf] %vm144_vm3, %v172_v20 }
  0xfa   :  { %246 = shalt.err (!%p243_p0)
}
  0xfb   :  { %158 = dma.vmem_to_hbm [thread:$0]  %s153_s27, 128, %s315_s3, [#allocation5], %s265_s22, %s265_s22, %s266_s23  }
  0xfc   :  { %259 = dma.done.wait [#allocation5], 128  }
  0xfd   :  { %260 = vsyncadd [#allocation5], 4294967168 }
  0xfe   :  { %162 = vsyncpa [#allocation4], 1 }
  0xff   :  { %163 = vsyncpa [#allocation7], 1 }
 0x100   :  { %164 = vsyncpa [#allocation5], 1 }

</bundles_post_ra>
